<compile_context>
chip_gen: v7x
topology: tpu7x:2x2x1
jax: 0.10.0
libtpu: 0.0.40
codegen_flags: <defaults>
</compile_context>

<pallas_src>
import functools

import jax
import jax.numpy as jnp
from jax.experimental import pallas as pl
from jax.experimental.pallas import tpu as pltpu

IN1 = 512          # fc1 in_features
H1 = 200           # fc1 out_features
H2 = 12            # fc2 out_features
H1P = 256          # lane-padded hidden width (matmul N dim / fc1 store width)
H2P = 128          # lane-padded fc2 matmul N dim (store is un-padded H2)
TB_MAX = 2048      # batch-tile cap (double-buffered tiles ~11 MiB VMEM)


def _round_up(x, m):
    return ((x + m - 1) // m) * m


def _pick_tb(b8):
    """Pick a batch tile: multiple of 8, >=2 grid steps when possible (v7x
    megacore split), preferring a tile that divides b8 (no wrapper pad)."""
    if b8 <= 8:
        return b8
    target = min(TB_MAX, _round_up(pl.cdiv(b8, 2), 8))
    lo = max(8, target // 2)
    for cand in range(target, lo - 1, -8):
        if b8 % cand == 0:
            return cand
    return target


def classifier_kernel(x_ref, w1_ref, b1_ref, w2_ref, b2_ref, fc1_ref, out_ref):
    # x:  (tb, 512) f32       w1: (512, 256) bf16   b1: (1, 256) f32
    # w2: (256, 128) bf16     b2: (1, 128) f32
    # fc1_ref: (tb, 256) bf16 out_ref: (tb, 12) f32
    x = x_ref[...].astype(jnp.bfloat16)       # in-kernel cast, hidden under DMA

    # fc1 = x @ W1 + b1  (MXU bf16 operands, f32 accumulate; bias/ReLU in f32).
    fc1 = jnp.dot(x, w1_ref[...], preferred_element_type=jnp.float32) + b1_ref[...]
    fc1_ref[...] = fc1.astype(fc1_ref.dtype)  # bf16 writeback

    # relu -> (dropout = identity in eval) -> fc2.
    h = jnp.maximum(fc1, 0.0).astype(jnp.bfloat16)
    out = jnp.dot(h, w2_ref[...], preferred_element_type=jnp.float32) + b2_ref[...]
    # Only the first 12 lanes are real; store un-padded (masked vst).
    out_ref[...] = out[:, :H2].astype(out_ref.dtype)


def prepare_params(w1, b1, w2, b2, *, compute_dtype=jnp.bfloat16):
    """One-time (outside the jitted forward): transpose to (in,out), zero-pad
    feature dims to lane multiples, cast matmul operands to bf16.

    w1: (200, 512)  b1: (200,)  w2: (12, 200)  b2: (12,)   [PyTorch layout]
    """
    w1_t = (
        jnp.zeros((IN1, H1P), jnp.float32).at[:, :H1].set(w1.T).astype(compute_dtype)
    )
    w2_t = (
        jnp.zeros((H1P, H2P), jnp.float32).at[:H1, :H2].set(w2.T).astype(compute_dtype)
    )
    b1_p = jnp.zeros((1, H1P), jnp.float32).at[:, :H1].set(b1)
    b2_p = jnp.zeros((1, H2P), jnp.float32).at[:, :H2].set(b2)
    return w1_t, b1_p, w2_t, b2_p


@functools.partial(jax.jit, static_argnames=("tb",))
def classifier_forward(feat, w1_t, b1_p, w2_t, b2_p, *, tb=None):
    """feat: (B, 512) f32.  Prepared params from prepare_params().

    Returns (fc1_out[B,200] bf16, out[B,12] f32).  fc1_out is bf16 because the
    second matmul consumes it at bf16 precision anyway; document for consumers.
    """
    B, in1 = feat.shape
    assert in1 == IN1

    b8 = _round_up(B, 8)
    if tb is None:
        tb = _pick_tb(b8)
    tb = _round_up(tb, 8) if tb > 8 else tb        # guard: sublane multiple of 8
    b_pad = _round_up(b8, tb)
    assert b_pad % tb == 0

    x = feat
    if b_pad != B:                                 # ragged tail only
        x = jnp.pad(x, ((0, b_pad - B), (0, 0)))

    grid = (b_pad // tb,)

    fc1_p, out_p = pl.pallas_call(
        classifier_kernel,
        out_shape=(
            jax.ShapeDtypeStruct((b_pad, H1P), jnp.bfloat16),
            jax.ShapeDtypeStruct((b_pad, H2), jnp.float32),
        ),
        grid=grid,
        in_specs=[
            pl.BlockSpec((tb, IN1), lambda i: (i, 0)),   # feat tile streams (f32)
            pl.BlockSpec((IN1, H1P), lambda i: (0, 0)),  # w1: VMEM-resident
            pl.BlockSpec((1, H1P), lambda i: (0, 0)),    # b1: VMEM-resident
            pl.BlockSpec((H1P, H2P), lambda i: (0, 0)),  # w2: VMEM-resident
            pl.BlockSpec((1, H2P), lambda i: (0, 0)),    # b2: VMEM-resident
        ],
        out_specs=(
            pl.BlockSpec((tb, H1P), lambda i: (i, 0)),
            pl.BlockSpec((tb, H2), lambda i: (i, 0)),    # un-padded, full last dim
        ),
        compiler_params=pltpu.CompilerParams(
            dimension_semantics=("parallel",),           # v7x: shard batch over 2 TCs
            vmem_limit_bytes=32 * 1024 * 1024,
        ),
        cost_estimate=pl.CostEstimate(
            flops=2 * b_pad * (IN1 * H1P + H1P * H2P),
            transcendentals=0,
            bytes_accessed=(
                b_pad * (IN1 * 4 + H1P * 2 + H2 * 4)     # feat read + fc1/out writes
                + (IN1 * H1P + H1P * H2P) * 2            # bf16 weights
                + (H1P + H2P) * 4                        # f32 biases
            ),
        ),
    )(x, w1_t, b1_p, w2_t, b2_p)

    # Strip batch padding and lane padding (padded lanes are exactly zero).
    return fc1_p[:B, :H1], out_p[:B]


def init_params(key):
    """Deterministic PyTorch-shaped params: Linear(512,200), Linear(200,12)."""
    k1, k2, k3, k4 = jax.random.split(key, 4)
    lim1 = 1.0 / jnp.sqrt(512.0)
    lim2 = 1.0 / jnp.sqrt(200.0)
    w1 = jax.random.uniform(k1, (H1, IN1), jnp.float32, -lim1, lim1)
    b1 = jax.random.uniform(k2, (H1,), jnp.float32, -lim1, lim1)
    w2 = jax.random.uniform(k3, (H2, H1), jnp.float32, -lim2, lim2)
    b2 = jax.random.uniform(k4, (H2,), jnp.float32, -lim2, lim2)
    return w1, b1, w2, b2


if __name__ == "__main__":
    key = jax.random.PRNGKey(0)
    kx, kp = jax.random.split(key)

    B = 8
    feat = jax.random.normal(kx, (B, IN1), jnp.float32)
    w1, b1, w2, b2 = init_params(kp)

    # Hoisted one-time param preparation (transpose + pad + bf16 cast).
    w1_t, b1_p, w2_t, b2_p = prepare_params(w1, b1, w2, b2)

    fc1_out, out = classifier_forward(feat, w1_t, b1_p, w2_t, b2_p)
    jax.block_until_ready((fc1_out, out))

    # Reference in plain f32 JAX (eval-mode dropout = identity). bf16 matmul
    # operands / bf16 fc1 writeback -> relaxed tolerance.
    fc1_ref = feat @ w1.T + b1
    out_ref = jnp.maximum(fc1_ref, 0.0) @ w2.T + b2
    assert fc1_out.shape == (B, H1) and out.shape == (B, H2)
    assert jnp.allclose(fc1_out.astype(jnp.float32), fc1_ref, atol=5e-2, rtol=5e-2)
    assert jnp.allclose(out, out_ref, atol=5e-2, rtol=5e-2)

    print("KERNEL_OK")
</pallas_src>

<mosaic_0001>
module attributes {stable_mosaic.version = 11 : i64} {
  func.func @classifier_kernel(%arg0: i32, %arg1: memref<8x512xf32, #tpu.memory_space<vmem>>, %arg2: memref<512x256xbf16, #tpu.memory_space<vmem>>, %arg3: memref<1x256xf32, #tpu.memory_space<vmem>>, %arg4: memref<256x128xbf16, #tpu.memory_space<vmem>>, %arg5: memref<1x128xf32, #tpu.memory_space<vmem>>, %arg6: memref<8x256xbf16, #tpu.memory_space<vmem>>, %arg7: memref<8x12xf32, #tpu.memory_space<vmem>>) attributes {dimension_semantics = [#tpu.dimension_semantics<parallel>], iteration_bounds = array<i64: 1>, scalar_prefetch = 0 : i64, scratch_operands = 0 : i64, tpu.core_type = #tpu.core_type<tc>, window_params = [{transform_indices = @transform_0, window_bounds = array<i64: 8, 512>}, {pipeline_mode = #tpu.pipeline_mode<synchronous>, transform_indices = @transform_1, window_bounds = array<i64: 512, 256>}, {pipeline_mode = #tpu.pipeline_mode<synchronous>, transform_indices = @transform_2, window_bounds = array<i64: 1, 256>}, {pipeline_mode = #tpu.pipeline_mode<synchronous>, transform_indices = @transform_3, window_bounds = array<i64: 256, 128>}, {pipeline_mode = #tpu.pipeline_mode<synchronous>, transform_indices = @transform_4, window_bounds = array<i64: 1, 128>}, {transform_indices = @transform_5, window_bounds = array<i64: 8, 256>}, {transform_indices = @transform_6, window_bounds = array<i64: 8, 12>}]} {
    %c0 = arith.constant 0 : index
    %c0_0 = arith.constant 0 : index
    %0 = vector.load %arg1[%c0, %c0_0] : memref<8x512xf32, #tpu.memory_space<vmem>>, vector<8x512xf32>
    %1 = arith.truncf %0 : vector<8x512xf32> to vector<8x512xbf16>
    %c0_1 = arith.constant 0 : index
    %c0_2 = arith.constant 0 : index
    %2 = vector.load %arg2[%c0_1, %c0_2] : memref<512x256xbf16, #tpu.memory_space<vmem>>, vector<512x256xbf16>
    %cst = arith.constant dense<0.000000e+00> : vector<8x256xf32>
    %3 = tpu.matmul %1, %2, %cst {dimension_numbers = #tpu.dot_dimension_numbers<[1], [0], [0], [1], [0, 0, 1, 1], [], []>} : vector<8x512xbf16>, vector<512x256xbf16>, vector<8x256xf32> -> vector<8x256xf32>
    %c0_3 = arith.constant 0 : index
    %c0_4 = arith.constant 0 : index
    %4 = vector.load %arg3[%c0_3, %c0_4] : memref<1x256xf32, #tpu.memory_space<vmem>>, vector<1x256xf32>
    %5 = vector.broadcast %4 : vector<1x256xf32> to vector<8x256xf32>
    %6 = arith.addf %3, %5 : vector<8x256xf32>
    %7 = arith.truncf %6 : vector<8x256xf32> to vector<8x256xbf16>
    %c0_5 = arith.constant 0 : index
    %c0_6 = arith.constant 0 : index
    %8 = vector.load %arg6[%c0_5, %c0_6] : memref<8x256xbf16, #tpu.memory_space<vmem>>, vector<8x256xbf16>
    tpu.vector_store %arg6[%c0_5, %c0_6], %7 {strides = array<i32>} : memref<8x256xbf16, #tpu.memory_space<vmem>>, vector<8x256xbf16>,
    %cst_7 = arith.constant 0.000000e+00 : f32
    %9 = vector.broadcast %cst_7 : f32 to vector<8x256xf32>
    %10 = arith.maximumf %6, %9 : vector<8x256xf32>
    %11 = arith.truncf %10 : vector<8x256xf32> to vector<8x256xbf16>
    %c0_8 = arith.constant 0 : index
    %c0_9 = arith.constant 0 : index
    %12 = vector.load %arg4[%c0_8, %c0_9] : memref<256x128xbf16, #tpu.memory_space<vmem>>, vector<256x128xbf16>
    %cst_10 = arith.constant dense<0.000000e+00> : vector<8x128xf32>
    %13 = tpu.matmul %11, %12, %cst_10 {dimension_numbers = #tpu.dot_dimension_numbers<[1], [0], [0], [1], [0, 0, 1, 1], [], []>} : vector<8x256xbf16>, vector<256x128xbf16>, vector<8x128xf32> -> vector<8x128xf32>
    %c0_11 = arith.constant 0 : index
    %c0_12 = arith.constant 0 : index
    %14 = vector.load %arg5[%c0_11, %c0_12] : memref<1x128xf32, #tpu.memory_space<vmem>>, vector<1x128xf32>
    %15 = vector.broadcast %14 : vector<1x128xf32> to vector<8x128xf32>
    %16 = arith.addf %13, %15 : vector<8x128xf32>
    %17 = vector.extract_strided_slice %16 {offsets = [0, 0], sizes = [8, 12], strides = [1, 1]} : vector<8x128xf32> to vector<8x12xf32>
    %c0_13 = arith.constant 0 : index
    %c0_14 = arith.constant 0 : index
    %18 = vector.load %arg7[%c0_13, %c0_14] : memref<8x12xf32, #tpu.memory_space<vmem>>, vector<8x12xf32>
    tpu.vector_store %arg7[%c0_13, %c0_14], %17 {strides = array<i32>} : memref<8x12xf32, #tpu.memory_space<vmem>>, vector<8x12xf32>,
    return
  }
  func.func @transform_0(%arg0: i32) -> (i32, i32) {
    %c0_i32 = arith.constant 0 : i32
    %c0_i32_0 = arith.constant 0 : i32
    return %arg0, %c0_i32 : i32, i32
  }
  func.func @transform_1(%arg0: i32) -> (i32, i32) {
    %c0_i32 = arith.constant 0 : i32
    %c0_i32_0 = arith.constant 0 : i32
    %c0_i32_1 = arith.constant 0 : i32
    return %c0_i32, %c0_i32_0 : i32, i32
  }
  func.func @transform_2(%arg0: i32) -> (i32, i32) {
    %c0_i32 = arith.constant 0 : i32
    %c0_i32_0 = arith.constant 0 : i32
    %c0_i32_1 = arith.constant 0 : i32
    return %c0_i32, %c0_i32_0 : i32, i32
  }
  func.func @transform_3(%arg0: i32) -> (i32, i32) {
    %c0_i32 = arith.constant 0 : i32
    %c0_i32_0 = arith.constant 0 : i32
    %c0_i32_1 = arith.constant 0 : i32
    return %c0_i32, %c0_i32_0 : i32, i32
  }
  func.func @transform_4(%arg0: i32) -> (i32, i32) {
    %c0_i32 = arith.constant 0 : i32
    %c0_i32_0 = arith.constant 0 : i32
    %c0_i32_1 = arith.constant 0 : i32
    return %c0_i32, %c0_i32_0 : i32, i32
  }
  func.func @transform_5(%arg0: i32) -> (i32, i32) {
    %c0_i32 = arith.constant 0 : i32
    %c0_i32_0 = arith.constant 0 : i32
    return %arg0, %c0_i32 : i32, i32
  }
  func.func @transform_6(%arg0: i32) -> (i32, i32) {
    %c0_i32 = arith.constant 0 : i32
    %c0_i32_0 = arith.constant 0 : i32
    return %arg0, %c0_i32 : i32, i32
  }
}

</mosaic_0001>

<bundles_post_ra>
// kernel: classifier_forward.1
= control target key start
LH: loop header
LB: loop body
LE: loop exit
PB: predicated region body
PF: predicated region fallthrough
CT: control target
= control target key end

     0   :  { %12 = vsyncpa [#allocation3], 0  ;;  %s1228_s0 = inlined_call_operand.hbm [shape: f32[8,512], index: 0, kind: input, shape index: {}]   ;;  %s1229_s1 = inlined_call_operand.hbm [shape: bf16[512,256], index: 1, kind: input, shape index: {}]   ;;  %s1230_s2 = inlined_call_operand.vmem [shape: f32[1,256], index: 2, kind: input, shape index: {}]   ;;  %s1231_s3 = inlined_call_operand.hbm [shape: bf16[256,128], index: 3, kind: input, shape index: {}]   ;;  %s1232_s4 = inlined_call_operand.vmem [shape: f32[1,128], index: 4, kind: input, shape index: {}]   ;;  %s1233_s5 = inlined_call_operand.hbm [shape: bf16[8,256], index: 5, kind: output, shape index: {0}]   ;;  %s1234_s6 = inlined_call_operand.hbm [shape: f32[8,12], index: 6, kind: output, shape index: {1}]  }
   0x1   :  { %13 = vsyncpa [#allocation6], 0 }
   0x2   :  { %14 = vsyncpa [#allocation4], 0 }
   0x3   :  { %15 = vsyncpa [#allocation10], 0  ;;  %s1118_s21 = smov [#allocation5]   ;;  %s1000_s25 = scalar_lea.hbm %s1229_s1, 8192 }
   0x4   :  { %s31_s22 = sshll.u32 %s1118_s21, 4  ;;  %p1001_p0 = scmp.ne.s32.totalorder %s1229_s1, %s1000_s25  ;;  %s32_s22 = int_to_ptr.vmem [resolvable:$true] %s31_s22 }
   0x5   :  { %p1004_p1 = scmp.lt.u32.totalorder %s1000_s25, %s1229_s1 }
   0x7   :  { %p1006_p2 = pnand %p1004_p1, %p1001_p0 }
   0x9   :  { %1009 = shalt.err (!%p1006_p2)
}
   0xa   :  { %s1010_s30 = scalar_lea.vmem %s32_s22, 8192  ;;  %p1015_p4 = scmp.lt.s32.totalorder %s32_s22, %s32_s22 }
   0xb   :  { %p1011_p3 = scmp.ne.s32.totalorder %s32_s22, %s1010_s30  ;;  %p1016_p5 = scmp.lt.s32.totalorder %s1010_s30, %s1010_s30 }
   0xd   :  { %p1017_p6 = por %p1016_p5, %p1015_p4 }
   0xf   :  { %p1018_p7 = pnand %p1017_p6, %p1011_p3 }
  0x11   :  { %1021 = shalt.err (!%p1018_p7)
}
  0x12   :  { %s1119_s7 = smov 128   ;;  %s1120_s8 = smov 8  }
  0x13   :  { %37 = dma.hbm_to_vmem [thread:$0]  %s1229_s1, 8192, %s32_s22, [#allocation6], %s1119_s7, %s1119_s7, %s1120_s8  }
  0x14   :  { %s1121_s11 = smov [#allocation2]   ;;  %s1122_s13 = smov [#allocation7]  }
  0x15   :  { %s22_s12 = sshll.u32 %s1121_s11, 4  ;;  %s45_s14 = sshll.u32 %s1122_s13, 4  ;;  %s23_s12 = int_to_ptr.vmem [resolvable:$true] %s22_s12  ;;  %s46_s14 = int_to_ptr.vmem [resolvable:$true] %s45_s14 }
  0x16   :  { %s1022_s17 = scalar_lea.hbm %s1228_s0, 512 }
  0x17   :  { %p1023_p8 = scmp.ne.s32.totalorder %s1228_s0, %s1022_s17  ;;  %p1026_p9 = scmp.lt.u32.totalorder %s1022_s17, %s1228_s0 }
  0x19   :  { %p1028_p10 = pnand %p1026_p9, %p1023_p8 }
  0x1b   :  { %1031 = shalt.err (!%p1028_p10)
}
  0x1c   :  { %s1032_s1 = scalar_lea.vmem %s23_s12, 512  ;;  %p1037_p12 = scmp.lt.s32.totalorder %s23_s12, %s23_s12 }
  0x1d   :  { %p1033_p11 = scmp.ne.s32.totalorder %s23_s12, %s1032_s1  ;;  %p1038_p13 = scmp.lt.s32.totalorder %s1032_s1, %s1032_s1 }
  0x1f   :  { %p1039_p0 = por %p1038_p13, %p1037_p12 }
  0x21   :  { %p1040_p1 = pnand %p1039_p0, %p1033_p11 }
  0x23   :  { %1043 = shalt.err (!%p1040_p1)
}
  0x24   :  { %25 = dma.hbm_to_vmem [thread:$0]  %s1228_s0, 512, %s23_s12, [#allocation3]  }
  0x25   :  { %s1044_s26 = scalar_lea.hbm %s1231_s3, 2048 }
  0x26   :  { %p1045_p2 = scmp.ne.s32.totalorder %s1231_s3, %s1044_s26  ;;  %p1048_p3 = scmp.lt.u32.totalorder %s1044_s26, %s1231_s3 }
  0x28   :  { %p1050_p4 = pnand %p1048_p3, %p1045_p2 }
  0x2a   :  { %1053 = shalt.err (!%p1050_p4)
}
  0x2b   :  { %s1054_s7 = scalar_lea.vmem %s46_s14, 2048  ;;  %p1059_p6 = scmp.lt.s32.totalorder %s46_s14, %s46_s14 }
  0x2c   :  { %p1055_p5 = scmp.ne.s32.totalorder %s46_s14, %s1054_s7  ;;  %p1060_p7 = scmp.lt.s32.totalorder %s1054_s7, %s1054_s7 }
  0x2e   :  { %p1061_p8 = por %p1060_p7, %p1059_p6 }
  0x30   :  { %p1062_p9 = pnand %p1061_p8, %p1055_p5 }
  0x32   :  { %1065 = shalt.err (!%p1062_p9)
}
  0x33   :  { %s1123_s0 = smov 64   ;;  %s1124_s8 = smov 4  }
  0x34   :  { %51 = dma.hbm_to_vmem [thread:$0]  %s1231_s3, 2048, %s46_s14, [#allocation6], %s1123_s0, %s1123_s0, %s1124_s8  }
  0x35   :  { %1110 = dma.done.wait [#allocation3], 512  }
  0x36   :  { %1111 = vsyncadd [#allocation3], 4294966784 }
  0x37   :  { %1112 = dma.done.wait [#allocation6], 10240  }
  0x38   :  { %1113 = vsyncadd [#allocation6], 4294957056  ;;  %v888_v0 = vld [vmem:[#allocation5 + $0x4] ss:$8 sps:$4 sm:$0xff]   ;;  %v892_v2 = vld [vmem:[#allocation5] ss:$8 sps:$4 sm:$0xff]  }
  0x39   :  { %v890_v1 = vld [vmem:[#allocation5 + $0x104] ss:$8 sps:$4 sm:$0xff]   ;;  %468 = vmatprep.subr.bf16.mxu1 %v888_v0  ;;  %v893_v3 = vld [vmem:[#allocation5 + $0x100] ss:$8 sps:$4 sm:$0xff]   ;;  %v894_v4 = vld [vmem:[#allocation5 + $0x14] ss:$8 sps:$4 sm:$0xff]  }
  0x3a   :  { %509 = vmatprep.subr.bf16.mxu0 %v890_v1  ;;  %469 = vmatpush1.bf16.msra.mxu1 %v892_v2  ;;  %v896_v5 = vld [vmem:[#allocation5 + $0x114] ss:$8 sps:$4 sm:$0xff]   ;;  %v898_v6 = vld [vmem:[#allocation5 + $0x10] ss:$8 sps:$4 sm:$0xff]   ;;  %v900_v8 = vld [vmem:[#allocation5 + $0x24] ss:$8 sps:$4 sm:$0xff]  }
  0x3b   :  { %510 = vmatpush1.bf16.msra.mxu0 %v893_v3  ;;  %470 = vmatprep.subr.bf16.mxu1 %v894_v4  ;;  %v899_v7 = vld [vmem:[#allocation5 + $0x110] ss:$8 sps:$4 sm:$0xff]   ;;  %v902_v9 = vld [vmem:[#allocation5 + $0x124] ss:$8 sps:$4 sm:$0xff]   ;;  %v904_v10 = vld [vmem:[#allocation5 + $0x20] ss:$8 sps:$4 sm:$0xff]  }
  0x3c   :  { %511 = vmatprep.subr.bf16.mxu0 %v896_v5  ;;  %v905_v11 = vld [vmem:[#allocation5 + $0x120] ss:$8 sps:$4 sm:$0xff]   ;;  %v906_v12 = vld [vmem:[#allocation5 + $0x34] ss:$8 sps:$4 sm:$0xff]   ;;  %v910_v14 = vld [vmem:[#allocation5 + $0x30] ss:$8 sps:$4 sm:$0xff]  }
  0x3d   :  { %v908_v13 = vld [vmem:[#allocation5 + $0x134] ss:$8 sps:$4 sm:$0xff]   ;;  %v911_v15 = vld [vmem:[#allocation5 + $0x130] ss:$8 sps:$4 sm:$0xff]   ;;  %v912_v16 = vld [vmem:[#allocation5 + $0x44] ss:$8 sps:$4 sm:$0xff]  }
  0x3e   :  { %471 = vmatpush1.bf16.msra.mxu1 %v898_v6  ;;  %v914_v17 = vld [vmem:[#allocation5 + $0x144] ss:$8 sps:$4 sm:$0xff]   ;;  %v916_v18 = vld [vmem:[#allocation5 + $0x40] ss:$8 sps:$4 sm:$0xff]   ;;  %v918_v20 = vld [vmem:[#allocation5 + $0x54] ss:$8 sps:$4 sm:$0xff]  }
  0x3f   :  { %512 = vmatpush1.bf16.msra.mxu0 %v899_v7  ;;  %472 = vmatprep.subr.bf16.mxu1 %v900_v8  ;;  %v917_v19 = vld [vmem:[#allocation5 + $0x140] ss:$8 sps:$4 sm:$0xff]   ;;  %v920_v21 = vld [vmem:[#allocation5 + $0x154] ss:$8 sps:$4 sm:$0xff]   ;;  %v922_v22 = vld [vmem:[#allocation5 + $0x50] ss:$8 sps:$4 sm:$0xff]  }
  0x40   :  { %513 = vmatprep.subr.bf16.mxu0 %v902_v9  ;;  %v923_v23 = vld [vmem:[#allocation5 + $0x150] ss:$8 sps:$4 sm:$0xff]   ;;  %v924_v24 = vld [vmem:[#allocation5 + $0x64] ss:$8 sps:$4 sm:$0xff]   ;;  %v928_v26 = vld [vmem:[#allocation5 + $0x60] ss:$8 sps:$4 sm:$0xff]  }
  0x41   :  { %v926_v25 = vld [vmem:[#allocation5 + $0x164] ss:$8 sps:$4 sm:$0xff]   ;;  %v929_v27 = vld [vmem:[#allocation5 + $0x160] ss:$8 sps:$4 sm:$0xff]   ;;  %v930_v28 = vld [vmem:[#allocation5 + $0x74] ss:$8 sps:$4 sm:$0xff]  }
  0x42   :  { %473 = vmatpush1.bf16.msra.mxu1 %v904_v10  ;;  %v932_v29 = vld [vmem:[#allocation5 + $0x174] ss:$8 sps:$4 sm:$0xff]   ;;  %v934_v30 = vld [vmem:[#allocation5 + $0x70] ss:$8 sps:$4 sm:$0xff]   ;;  %v936_v32 = vld [vmem:[#allocation5 + $0x84] ss:$8 sps:$4 sm:$0xff]  }
  0x43   :  { %514 = vmatpush1.bf16.msra.mxu0 %v905_v11  ;;  %474 = vmatprep.subr.bf16.mxu1 %v906_v12  ;;  %v935_v31 = vld [vmem:[#allocation5 + $0x170] ss:$8 sps:$4 sm:$0xff]   ;;  %v938_v33 = vld [vmem:[#allocation5 + $0x184] ss:$8 sps:$4 sm:$0xff]   ;;  %v940_v34 = vld [vmem:[#allocation5 + $0x80] ss:$8 sps:$4 sm:$0xff]  }
  0x44   :  { %515 = vmatprep.subr.bf16.mxu0 %v908_v13  ;;  %v941_v35 = vld [vmem:[#allocation5 + $0x180] ss:$8 sps:$4 sm:$0xff]   ;;  %v942_v36 = vld [vmem:[#allocation5 + $0x94] ss:$8 sps:$4 sm:$0xff]   ;;  %v946_v38 = vld [vmem:[#allocation5 + $0x90] ss:$8 sps:$4 sm:$0xff]  }
  0x45   :  { %v944_v37 = vld [vmem:[#allocation5 + $0x194] ss:$8 sps:$4 sm:$0xff]   ;;  %v947_v39 = vld [vmem:[#allocation5 + $0x190] ss:$8 sps:$4 sm:$0xff]   ;;  %v948_v40 = vld [vmem:[#allocation5 + $0xa4] ss:$8 sps:$4 sm:$0xff]  }
  0x46   :  { %475 = vmatpush1.bf16.msra.mxu1 %v910_v14  ;;  %v950_v41 = vld [vmem:[#allocation5 + $0x1a4] ss:$8 sps:$4 sm:$0xff]   ;;  %v952_v42 = vld [vmem:[#allocation5 + $0xa0] ss:$8 sps:$4 sm:$0xff]   ;;  %v954_v44 = vld [vmem:[#allocation5 + $0xb4] ss:$8 sps:$4 sm:$0xff]  }
  0x47   :  { %516 = vmatpush1.bf16.msra.mxu0 %v911_v15  ;;  %476 = vmatprep.subr.bf16.mxu1 %v912_v16  ;;  %v953_v43 = vld [vmem:[#allocation5 + $0x1a0] ss:$8 sps:$4 sm:$0xff]   ;;  %v956_v45 = vld [vmem:[#allocation5 + $0x1b4] ss:$8 sps:$4 sm:$0xff]   ;;  %v958_v47 = vld [vmem:[#allocation5 + $0xb0] ss:$8 sps:$4 sm:$0xff]  }
  0x48   :  { %517 = vmatprep.subr.bf16.mxu0 %v914_v17  ;;  %v65_v46 = vld [vmem:[#allocation2 + $0x8] sm:$0xff]  ;;  %v959_v48 = vld [vmem:[#allocation5 + $0x1b0] ss:$8 sps:$4 sm:$0xff]   ;;  %v966_v56 = vld [vmem:[#allocation5 + $0xd4] ss:$8 sps:$4 sm:$0xff]  }
  0x49   :  { %v69_v49 = vpack.c.bf16 %v65_v46, %v65_v46  ;;  %v67_v50 = vld [vmem:[#allocation2 + $0x18] sm:$0xff]  ;;  %v960_v51 = vld [vmem:[#allocation5 + $0xc4] ss:$8 sps:$4 sm:$0xff]   ;;  %v964_v54 = vld [vmem:[#allocation5 + $0xc0] ss:$8 sps:$4 sm:$0xff]  }
  0x4a   :  { %477 = vmatpush1.bf16.msra.mxu1 %v916_v18  ;;  %v71_v52 = vpack.c.bf16 %v67_v50, %v67_v50  ;;  %v962_v53 = vld [vmem:[#allocation5 + $0x1c4] ss:$8 sps:$4 sm:$0xff]   ;;  %v965_v55 = vld [vmem:[#allocation5 + $0x1c0] ss:$8 sps:$4 sm:$0xff]   ;;  %v968_v57 = vld [vmem:[#allocation5 + $0x1d4] ss:$8 sps:$4 sm:$0xff]  }
  0x4b   :  { %518 = vmatpush1.bf16.msra.mxu0 %v917_v19  ;;  %478 = vmatprep.subr.bf16.mxu1 %v918_v20  ;;  %v970_v58 = vld [vmem:[#allocation5 + $0xd0] ss:$8 sps:$4 sm:$0xff]   ;;  %v972_v60 = vld [vmem:[#allocation5 + $0xe4] ss:$8 sps:$4 sm:$0xff]   ;;  %v976_v62 = vld [vmem:[#allocation5 + $0xe0] ss:$8 sps:$4 sm:$0xff]  }
  0x4c   :  { %519 = vmatprep.subr.bf16.mxu0 %v920_v21  ;;  %500 = vmatprep.mubr.bf16.mxu1 %v69_v49  ;;  %v971_v59 = vld [vmem:[#allocation5 + $0x1d0] ss:$8 sps:$4 sm:$0xff]   ;;  %v974_v61 = vld [vmem:[#allocation5 + $0x1e4] ss:$8 sps:$4 sm:$0xff]   ;;  %v977_v63 = vld [vmem:[#allocation5 + $0x1e0] ss:$8 sps:$4 sm:$0xff]  }
  0x4d   :  { %541 = vmatprep.mubr.bf16.mxu0 %v71_v52  ;;  %v978_v0 = vld [vmem:[#allocation5 + $0xf4] ss:$8 sps:$4 sm:$0xff]   ;;  %v982_v2 = vld [vmem:[#allocation5 + $0xf0] ss:$8 sps:$4 sm:$0xff]   ;;  %v64_v4 = vld [vmem:[#allocation2] sm:$0xff] }
  0x4e   :  { %479 = vmatpush1.bf16.msra.mxu1 %v922_v22  ;;  %v980_v1 = vld [vmem:[#allocation5 + $0x1f4] ss:$8 sps:$4 sm:$0xff]   ;;  %v983_v3 = vld [vmem:[#allocation5 + $0x1f0] ss:$8 sps:$4 sm:$0xff]   ;;  %v984_v6 = vld [vmem:[#allocation7 + $0x40] sm:$0xff]   ;;  %v68_v7 = vpack.c.bf16 %v64_v4, %v64_v4 }
  0x4f   :  { %520 = vmatpush1.bf16.msra.mxu0 %v923_v23  ;;  %480 = vmatprep.subr.bf16.mxu1 %v924_v24  ;;  %v66_v5 = vld [vmem:[#allocation2 + $0x10] sm:$0xff]  ;;  %v985_v9 = vld [vmem:[#allocation7] sm:$0xff]   ;;  %v986_v10 = vld [vmem:[#allocation7 + $0x48] sm:$0xff]   ;;  %v138_v24 = vlaneseq }
  0x50   :  { %521 = vmatprep.subr.bf16.mxu0 %v926_v25  ;;  %v70_v8 = vpack.c.bf16 %v66_v5, %v66_v5  ;;  %v987_v11 = vld [vmem:[#allocation7 + $0x8] sm:$0xff]   ;;  %v988_v12 = vld [vmem:[#allocation7 + $0x50] sm:$0xff]   ;;  %v990_v14 = vld [vmem:[#allocation7 + $0x58] sm:$0xff]  }
  0x51   :  { %v989_v13 = vld [vmem:[#allocation7 + $0x10] sm:$0xff]   ;;  %v991_v15 = vld [vmem:[#allocation7 + $0x18] sm:$0xff]   ;;  %v992_v16 = vld [vmem:[#allocation7 + $0x60] sm:$0xff]   ;;  %v139_v25 = vshrl.u32 %v138_v24, 7 }
  0x52   :  { %481 = vmatpush1.bf16.msra.mxu1 %v928_v26  ;;  %v993_v17 = vld [vmem:[#allocation7 + $0x20] sm:$0xff]   ;;  %v994_v18 = vld [vmem:[#allocation7 + $0x68] sm:$0xff]   ;;  %v996_v20 = vld [vmem:[#allocation7 + $0x70] sm:$0xff]  }
  0x53   :  { %522 = vmatpush1.bf16.msra.mxu0 %v929_v27  ;;  %482 = vmatprep.subr.bf16.mxu1 %v930_v28  ;;  %v995_v19 = vld [vmem:[#allocation7 + $0x28] sm:$0xff]   ;;  %v997_v21 = vld [vmem:[#allocation7 + $0x30] sm:$0xff]   ;;  %v998_v22 = vld [vmem:[#allocation7 + $0x78] sm:$0xff]   ;;  %v140_v26 = vsub.s32 0, %v139_v25  ;;  %v144_v28 = vsub.s32 1, %v139_v25 }
  0x54   :  { %523 = vmatprep.subr.bf16.mxu0 %v932_v29  ;;  %v999_v23 = vld [vmem:[#allocation7 + $0x38] sm:$0xff]   ;;  %v136_v27 = vld [vmem:[%s1230_s2] sm:$0x3]  ;;  %s1125_s2 = smov [#allocation8]  }
  0x55   :  { %v141_v29 = vrot.slane %v136_v27, %v140_v26  ;;  %s746_s12 = sshll.u32 %s1125_s2, 4  ;;  %s747_s12 = int_to_ptr.vmem [resolvable:$true] %s746_s12 }
  0x56   :  { %483 = vmatpush1.bf16.msra.mxu1 %v934_v30  ;;  %v145_v30 = vrot.slane %v136_v27, %v144_v28  ;;  %s1066_s13 = scalar_lea.vmem %s747_s12, 128  ;;  %p1071_p11 = scmp.lt.s32.totalorder %s747_s12, %s747_s12 }
  0x57   :  { %524 = vmatpush1.bf16.msra.mxu0 %v935_v31  ;;  %484 = vmatprep.subr.bf16.mxu1 %v936_v32  ;;  %p1067_p10 = scmp.ne.s32.totalorder %s747_s12, %s1066_s13  ;;  %p1072_p12 = scmp.lt.s32.totalorder %s1066_s13, %s1066_s13 }
  0x58   :  { %525 = vmatprep.subr.bf16.mxu0 %v938_v33 }
  0x59   :  { %p1073_p13 = por %p1072_p12, %p1071_p11 }
  0x5a   :  { %485 = vmatpush1.bf16.msra.mxu1 %v940_v34 }
  0x5b   :  { %526 = vmatpush1.bf16.msra.mxu0 %v941_v35  ;;  %486 = vmatprep.subr.bf16.mxu1 %v942_v36  ;;  %p1074_p0 = pnand %p1073_p13, %p1067_p10 }
  0x5c   :  { %527 = vmatprep.subr.bf16.mxu0 %v944_v37 }
  0x5e   :  { %487 = vmatpush1.bf16.msra.mxu1 %v946_v38 }
  0x5f   :  { %528 = vmatpush1.bf16.msra.mxu0 %v947_v39  ;;  %488 = vmatprep.subr.bf16.mxu1 %v948_v40 }
  0x60   :  { %529 = vmatprep.subr.bf16.mxu0 %v950_v41 }
  0x62   :  { %489 = vmatpush1.bf16.msra.mxu1 %v952_v42 }
  0x63   :  { %530 = vmatpush1.bf16.msra.mxu0 %v953_v43  ;;  %490 = vmatprep.subr.bf16.mxu1 %v954_v44 }
  0x64   :  { %531 = vmatprep.subr.bf16.mxu0 %v956_v45 }
  0x66   :  { %491 = vmatpush1.bf16.msra.mxu1 %v958_v47 }
  0x67   :  { %532 = vmatpush1.bf16.msra.mxu0 %v959_v48  ;;  %492 = vmatprep.subr.bf16.mxu1 %v960_v51 }
  0x68   :  { %533 = vmatprep.subr.bf16.mxu0 %v962_v53 }
  0x6a   :  { %493 = vmatpush1.bf16.msra.mxu1 %v964_v54 }
  0x6b   :  { %534 = vmatpush1.bf16.msra.mxu0 %v965_v55  ;;  %494 = vmatprep.subr.bf16.mxu1 %v966_v56 }
  0x6c   :  { %535 = vmatprep.subr.bf16.mxu0 %v968_v57 }
  0x6e   :  { %495 = vmatpush1.bf16.msra.mxu1 %v970_v58 }
  0x6f   :  { %536 = vmatpush1.bf16.msra.mxu0 %v971_v59  ;;  %496 = vmatprep.subr.bf16.mxu1 %v972_v60 }
  0x70   :  { %537 = vmatprep.subr.bf16.mxu0 %v974_v61 }
  0x72   :  { %497 = vmatpush1.bf16.msra.mxu1 %v976_v62 }
  0x73   :  { %538 = vmatpush1.bf16.msra.mxu0 %v977_v63  ;;  %498 = vmatprep.subr.bf16.mxu1 %v978_v0 }
  0x74   :  { %539 = vmatprep.subr.bf16.mxu0 %v980_v1 }
  0x76   :  { %499 = vmatpush1.bf16.msra.mxu1 %v982_v2 }
  0x77   :  { %540 = vmatpush1.bf16.msra.mxu0 %v983_v3  ;;  %853 = vmatprep.subr.bf16.mxu1 %v984_v6 }
  0x79   :  { %501 = vmatmul.mubr.bf16.vlgmr.msra.gmra.mrb[0].mxu1 %v68_v7 }
  0x7a   :  { %542 = vmatmul.mubr.bf16.vlgmr.msra.gmra.mrb[0].mxu0 %v70_v8  ;;  %854 = vmatpush3.bf16.msra.mxu1 %v985_v9 }
  0x7b   :  { %855 = vmatprep.subr.bf16.mxu1 %v986_v10 }
  0x7e   :  { %856 = vmatpush3.bf16.msra.mxu1 %v987_v11 }
  0x7f   :  { %857 = vmatprep.subr.bf16.mxu1 %v988_v12 }
  0x82   :  { %858 = vmatpush3.bf16.msra.mxu1 %v989_v13 }
  0x83   :  { %859 = vmatprep.subr.bf16.mxu1 %v990_v14 }
  0x86   :  { %860 = vmatpush3.bf16.msra.mxu1 %v991_v15 }
  0x87   :  { %861 = vmatprep.subr.bf16.mxu1 %v992_v16 }
  0x8a   :  { %862 = vmatpush3.bf16.msra.mxu1 %v993_v17 }
  0x8b   :  { %863 = vmatprep.subr.bf16.mxu1 %v994_v18 }
  0x8e   :  { %864 = vmatpush3.bf16.msra.mxu1 %v995_v19 }
  0x8f   :  { %865 = vmatprep.subr.bf16.mxu1 %v996_v20 }
  0x92   :  { %866 = vmatpush3.bf16.msra.mxu1 %v997_v21 }
  0x93   :  { %867 = vmatprep.subr.bf16.mxu1 %v998_v22 }
  0x96   :  { %868 = vmatpush3.bf16.msra.mxu1 %v999_v23 }
 0x14c   :  { %v502_v31 = vpop.f32.mrb[0].mxu1 }
 0x14d   :  { %v543_v32 = vpop.f32.mrb[0].mxu0  ;;  %v503_v33 = vadd.f32 %v502_v31, %v141_v29  ;;  %v504_v34 = vpop.f32.mrb[1].mxu1 }
 0x14e   :  { %v545_v35 = vpop.f32.mrb[1].mxu0  ;;  %v505_v36 = vadd.f32 %v504_v34, %v145_v30  ;;  %v506_v37 = vpop.f32.mrb[2].mxu1 }
 0x14f   :  { %v547_v38 = vpop.f32.mrb[2].mxu0  ;;  %v544_v39 = vadd.f32 %v543_v32, %v503_v33  ;;  %v507_v40 = vpop.f32.mrb[3].mxu1 }
 0x150   :  { %v548_v41 = vpop.f32.mrb[3].mxu0  ;;  %v546_v42 = vadd.f32 %v545_v35, %v505_v36 }
 0x151   :  { %v559_v43 = vmax.f32 %v544_v39, 0.0 }
 0x152   :  { %v852_v44 = vpack.c.bf16 %v546_v42, %v544_v39  ;;  %v560_v45 = vmax.f32 %v546_v42, 0.0 }
 0x153   :  { %v561_v47 = vpack.c.bf16 %v559_v43, %v559_v43 }
 0x154   :  { %v562_v46 = vpack.c.bf16 %v560_v45, %v560_v45  ;;  %558 = vst [vmem:[#allocation8] sm:$0xff] %v852_v44 }
 0x156   :  { %730 = vmatprep.mubr.bf16.mxu1 %v562_v46 }
 0x157   :  { %731 = vmatmul.mubr.bf16.vlgmr.msra.gmra.mrb[4].mxu1 %v561_v47 }
 0x158   :  { %1077 = shalt.err (!%p1074_p0)
}
 0x159   :  { %s1078_s16 = scalar_lea.hbm %s1233_s5, 128 }
 0x15a   :  { %p1079_p1 = scmp.ne.s32.totalorder %s1233_s5, %s1078_s16  ;;  %p1082_p2 = scmp.lt.u32.totalorder %s1078_s16, %s1233_s5 }
 0x15c   :  { %p1084_p3 = pnand %p1082_p2, %p1079_p1 }
 0x15e   :  { %1087 = shalt.err (!%p1084_p3)
}
 0x15f   :  { %749 = dma.vmem_to_hbm [thread:$0]  %s747_s12, 128, %s1233_s5, [#allocation4]   ;;  %v835_v49 = vld [vmem:[%s1232_s4] ss:$0 sm:$0xff]  ;;  %vm738_vm0 = vcmask 97280  }
 0x160   :  { %s1126_s24 = smov [#allocation9]  }
 0x161   :  { %s756_s25 = sshll.u32 %s1126_s24, 4  ;;  %s757_s25 = int_to_ptr.vmem [resolvable:$true] %s756_s25 }
 0x162   :  { %s1088_s26 = scalar_lea.vmem %s757_s25, 128  ;;  %p1093_p5 = scmp.lt.s32.totalorder %s757_s25, %s757_s25 }
 0x163   :  { %p1089_p4 = scmp.ne.s32.totalorder %s757_s25, %s1088_s26  ;;  %p1094_p6 = scmp.lt.s32.totalorder %s1088_s26, %s1088_s26 }
 0x165   :  { %p1095_p7 = por %p1094_p6, %p1093_p5 }
 0x167   :  { %p1096_p8 = pnand %p1095_p7, %p1089_p4 }
 0x22a   :  { %v869_v48 = vpop.f32.mrb[4].mxu1 }
 0x22b   :  { %v870_v50 = vpop.f32.mrb[5].mxu1 }
 0x22c   :  { %v871_v51 = vadd.f32 %v870_v50, %v869_v48  ;;  %v872_v52 = vpop.f32.mrb[6].mxu1 }
 0x22d   :  { %v873_v53 = vpop.f32.mrb[7].mxu1 }
 0x22e   :  { %v733_v54 = vadd.f32 %v871_v51, %v835_v49 }
 0x230   :  { %739 = vst.msk [vmem:[#allocation9] sm:$0xff] %vm738_vm0, %v733_v54 }
 0x231   :  { %1099 = shalt.err (!%p1096_p8)
}
 0x232   :  { %s1100_s4 = scalar_lea.hbm %s1234_s6, 128 }
 0x233   :  { %p1101_p9 = scmp.ne.s32.totalorder %s1234_s6, %s1100_s4  ;;  %p1104_p10 = scmp.lt.u32.totalorder %s1100_s4, %s1234_s6 }
 0x235   :  { %p1106_p11 = pnand %p1104_p10, %p1101_p9 }
 0x237   :  { %1109 = shalt.err (!%p1106_p11)
}
 0x238   :  { %759 = dma.vmem_to_hbm [thread:$0]  %s757_s25, 128, %s1234_s6, [#allocation10]  }
 0x239   :  { %1114 = dma.done.wait [#allocation4], 128  }
 0x23a   :  { %1115 = vsyncadd [#allocation4], 4294967168 }
 0x23b   :  { %1116 = dma.done.wait [#allocation10], 128  }
 0x23c   :  { %1117 = vsyncadd [#allocation10], 4294967168 }
 0x23d   :  { %766 = vsyncpa [#allocation3], 1 }
 0x23e   :  { %767 = vsyncpa [#allocation6], 1 }
 0x23f   :  { %768 = vsyncpa [#allocation4], 1 }
 0x240   :  { %769 = vsyncpa [#allocation10], 1 }

</bundles_post_ra>
